<compile_context>
chip_gen: v6e
topology: v6e:2x2x1
jax: 0.10.0
libtpu: 0.0.40
codegen_flags: <defaults>
</compile_context>

<pallas_src>
import jax
import jax.numpy as jnp
from jax.experimental import pallas as pl
from jax.experimental.pallas import tpu as pltpu


def _mag_reg_kernel(a_ref, p_ref, o_ref):
    a = a_ref[...].astype(jnp.float32)                          # (tm, D)
    p = p_ref[...].astype(jnp.float32)                          # (tm, D)

    # Per-row L2 magnitudes; keepdims keeps everything in 2-D (tm, 1) tiles.
    a_mag = jnp.sqrt(jnp.sum(a * a, axis=1, keepdims=True))     # (tm, 1)
    p_mag = jnp.sqrt(jnp.sum(p * p, axis=1, keepdims=True))     # (tm, 1)

    d = a_mag - p_mag
    o_ref[...] = d * d                                          # (tm, 1)


def _choose_tm(N, D, itemsize):
    """Largest row tile s.t. double-buffered inputs stay ~16 MiB."""
    budget = 16 * 1024 * 1024
    tm = budget // (4 * D * itemsize)       # 2 inputs x 2 buffers
    tm = int(max(32, min(1024, tm)))
    tm = (tm // 32) * 32                    # multiple of 32: safe for f32/bf16/int8 packing
    if N <= tm:
        return N                            # single full-extent block (any N allowed)
    return tm


def magnitude_regularization(raw_anchor, raw_pos, *, tm=None):
    """raw_anchor, raw_pos: (N, D). Returns scalar float32 loss."""
    N, D = raw_anchor.shape
    assert raw_pos.shape == (N, D)
    itemsize = jnp.dtype(raw_anchor.dtype).itemsize

    if tm is None:
        tm = _choose_tm(N, D, itemsize)
    tm = min(tm, N)

    grid = (pl.cdiv(N, tm),)

    per_row_sq_diff = pl.pallas_call(
        _mag_reg_kernel,
        out_shape=jax.ShapeDtypeStruct((N, 1), jnp.float32),
        grid=grid,
        in_specs=[
            pl.BlockSpec((tm, D), lambda i: (i, 0)),
            pl.BlockSpec((tm, D), lambda i: (i, 0)),
        ],
        out_specs=pl.BlockSpec((tm, 1), lambda i: (i, 0)),
        compiler_params=pltpu.CompilerParams(
            # Every grid step writes its own output block -> no races, and
            # megacore can shard the row axis across TensorCores (v7x).
            dimension_semantics=("parallel",),
            # Above v5e's 16 MiB default scoped limit, below v7x's 64 MiB
            # physical VMEM; actual use is ~16-20 MiB.
            vmem_limit_bytes=48 * 1024 * 1024,
        ),
        cost_estimate=pl.CostEstimate(
            flops=4 * N * D,
            transcendentals=2 * N,
            bytes_accessed=2 * N * D * itemsize + N * 4,
        ),
    )(raw_anchor, raw_pos)

    # Tiny (N, 1) reduction + mean done in plain JAX (float32).
    return jnp.mean(per_row_sq_diff)


def _reference(raw_anchor, raw_pos):
    a_mag = jnp.sqrt(jnp.sum(raw_anchor.astype(jnp.float32) ** 2, axis=1))
    p_mag = jnp.sqrt(jnp.sum(raw_pos.astype(jnp.float32) ** 2, axis=1))
    return jnp.mean((a_mag - p_mag) ** 2)


if __name__ == "__main__":
    key = jax.random.PRNGKey(0)
    k1, k2 = jax.random.split(key)

    # Small shapes: 20 descriptors of dim 128 (N deliberately not a power of
    # two / tile multiple to exercise the ragged-row handling).
    N, D = 20, 128
    raw_anchor = jax.random.normal(k1, (N, D), dtype=jnp.float32)
    raw_pos = jax.random.normal(k2, (N, D), dtype=jnp.float32)

    ref = jax.block_until_ready(_reference(raw_anchor, raw_pos))

    # 1) Default (auto-sized) tile: single full-extent block here.
    out = jax.block_until_ready(magnitude_regularization(raw_anchor, raw_pos))
    assert jnp.allclose(out, ref, rtol=1e-5, atol=1e-5), (out, ref)

    # 2) Explicit small tile to exercise the multi-block + partial-edge path.
    out_tiled = jax.block_until_ready(
        magnitude_regularization(raw_anchor, raw_pos, tm=8)
    )
    assert jnp.allclose(out_tiled, ref, rtol=1e-5, atol=1e-5), (out_tiled, ref)

    print("KERNEL_OK")
</pallas_src>

<mosaic_0001>
module attributes {stable_mosaic.version = 11 : i64} {
  func.func @_mag_reg_kernel(%arg0: i32, %arg1: memref<20x128xf32, #tpu.memory_space<vmem>>, %arg2: memref<20x128xf32, #tpu.memory_space<vmem>>, %arg3: memref<20x1xf32, #tpu.memory_space<vmem>>) attributes {dimension_semantics = [#tpu.dimension_semantics<parallel>], iteration_bounds = array<i64: 1>, scalar_prefetch = 0 : i64, scratch_operands = 0 : i64, tpu.core_type = #tpu.core_type<tc>, window_params = [{transform_indices = @transform_0, window_bounds = array<i64: 20, 128>}, {transform_indices = @transform_1, window_bounds = array<i64: 20, 128>}, {transform_indices = @transform_2, window_bounds = array<i64: 20, 1>}]} {
    %c0 = arith.constant 0 : index
    %c0_0 = arith.constant 0 : index
    %0 = vector.load %arg1[%c0, %c0_0] : memref<20x128xf32, #tpu.memory_space<vmem>>, vector<20x128xf32>
    %c0_1 = arith.constant 0 : index
    %c0_2 = arith.constant 0 : index
    %1 = vector.load %arg2[%c0_1, %c0_2] : memref<20x128xf32, #tpu.memory_space<vmem>>, vector<20x128xf32>
    %2 = arith.mulf %0, %0 : vector<20x128xf32>
    %cst = arith.constant dense<0.000000e+00> : vector<20xf32>
    %3 = vector.multi_reduction <add>, %2, %cst [1] : vector<20x128xf32> to vector<20xf32>
    %4 = vector.shape_cast %3 : vector<20xf32> to vector<20x1xf32>
    %5 = math.sqrt %4 : vector<20x1xf32>
    %6 = arith.mulf %1, %1 : vector<20x128xf32>
    %cst_3 = arith.constant dense<0.000000e+00> : vector<20xf32>
    %7 = vector.multi_reduction <add>, %6, %cst_3 [1] : vector<20x128xf32> to vector<20xf32>
    %8 = vector.shape_cast %7 : vector<20xf32> to vector<20x1xf32>
    %9 = math.sqrt %8 : vector<20x1xf32>
    %10 = arith.subf %5, %9 : vector<20x1xf32>
    %11 = arith.mulf %10, %10 : vector<20x1xf32>
    %c0_4 = arith.constant 0 : index
    %c0_5 = arith.constant 0 : index
    %12 = vector.load %arg3[%c0_4, %c0_5] : memref<20x1xf32, #tpu.memory_space<vmem>>, vector<20x1xf32>
    tpu.vector_store %arg3[%c0_4, %c0_5], %11 {strides = array<i32>} : memref<20x1xf32, #tpu.memory_space<vmem>>, vector<20x1xf32>,
    return
  }
  func.func @transform_0(%arg0: i32) -> (i32, i32) {
    %c0_i32 = arith.constant 0 : i32
    %c0_i32_0 = arith.constant 0 : i32
    return %arg0, %c0_i32 : i32, i32
  }
  func.func @transform_1(%arg0: i32) -> (i32, i32) {
    %c0_i32 = arith.constant 0 : i32
    %c0_i32_0 = arith.constant 0 : i32
    return %arg0, %c0_i32 : i32, i32
  }
  func.func @transform_2(%arg0: i32) -> (i32, i32) {
    %c0_i32 = arith.constant 0 : i32
    %c0_i32_0 = arith.constant 0 : i32
    return %arg0, %c0_i32 : i32, i32
  }
}

</mosaic_0001>

<bundles_post_ra>
// kernel: tpu_custom_call.1
= control target key start
LH: loop header
LB: loop body
LE: loop exit
PB: predicated region body
PF: predicated region fallthrough
CT: control target
= control target key end

     0   :  { %7 = vsyncpa [#allocation3], 0  ;;  %s223_s0 = inlined_call_operand.hbm [shape: f32[20,128], index: 0, kind: input, shape index: {}]   ;;  %s224_s1 = inlined_call_operand.hbm [shape: f32[20,128], index: 1, kind: input, shape index: {}]   ;;  %s225_s2 = inlined_call_operand.vmem [shape: f32[20,1], index: 2, kind: output, shape index: {}]  }
   0x1   :  { %8 = vsyncpa [#allocation5], 0  ;;  %s185_s9 = smov [#allocation2]  }
   0x2   :  { %s14_s10 = sshll.u32 %s185_s9, 4  ;;  %s15_s10 = int_to_ptr.vmem [resolvable:$true] %s14_s10 }
   0x3   :  { %s149_s11 = scalar_lea.vmem %s15_s10, 384  ;;  %p154_p1 = scmp.lt.s32.totalorder %s15_s10, %s15_s10 }
   0x4   :  { %p150_p0 = scmp.ne.s32.totalorder %s15_s10, %s149_s11  ;;  %p155_p2 = scmp.lt.s32.totalorder %s149_s11, %s149_s11 }
   0x6   :  { %p156_p3 = por %p155_p2, %p154_p1 }
   0x8   :  { %p157_p4 = pnand %p156_p3, %p150_p0 }
   0xa   :  { %160 = shalt.err (!%p157_p4)
}
   0xb   :  { %s186_s12 = smov 128   ;;  %s187_s13 = smov 8  }
   0xc   :  { %20 = dma.hbm_to_vmem [thread:$0]  %s223_s0, 384, %s15_s10, [#allocation3], %s186_s12, %s186_s12, %s187_s13  }
   0xd   :  { %s188_s16 = smov [#allocation4]  }
   0xe   :  { %s26_s17 = sshll.u32 %s188_s16, 4  ;;  %s27_s17 = int_to_ptr.vmem [resolvable:$true] %s26_s17 }
   0xf   :  { %s169_s18 = scalar_lea.vmem %s27_s17, 384  ;;  %p174_p6 = scmp.lt.s32.totalorder %s27_s17, %s27_s17 }
  0x10   :  { %p170_p5 = scmp.ne.s32.totalorder %s27_s17, %s169_s18  ;;  %p175_p7 = scmp.lt.s32.totalorder %s169_s18, %s169_s18 }
  0x12   :  { %p176_p8 = por %p175_p7, %p174_p6 }
  0x14   :  { %p177_p9 = pnand %p176_p8, %p170_p5 }
  0x16   :  { %180 = shalt.err (!%p177_p9)
}
  0x17   :  { %32 = dma.hbm_to_vmem [thread:$0]  %s224_s1, 384, %s27_s17, [#allocation5], %s186_s12, %s186_s12, %s187_s13  }
  0x18   :  { %181 = dma.done.wait [#allocation3], 384  }
  0x19   :  { %182 = vsyncadd [#allocation3], 4294966912 }
  0x1a   :  { %183 = dma.done.wait [#allocation5], 384  }
  0x1b   :  { %184 = vsyncadd [#allocation5], 4294966912  ;;  %v42_v0 = vld [vmem:[#allocation4] sm:$0xff]  ;;  %v39_v1 = vld [vmem:[#allocation2] sm:$0xff]  ;;  %vm52_vm0 = vcmask 1043456   ;;  %vm114_vm6 = vcmask 7168  }
  0x1c   :  { %v41_v2 = vld [vmem:[#allocation2 + $0x10] sm:$0xf]  ;;  %v77_v3 = vmul.f32 %v42_v0, %v42_v0  ;;  %v45_v4 = vmul.f32 %v39_v1, %v39_v1  ;;  %v40_v6 = vld [vmem:[#allocation2 + $0x8] sm:$0xff]  ;;  %v43_v11 = vld [vmem:[#allocation4 + $0x8] sm:$0xff]  ;;  %vm117_vm14 = vcmask 3072  }
  0x1d   :  { %v47_v5 = vmul.f32 %v41_v2, %v41_v2  ;;  %v44_v7 = vld [vmem:[#allocation4 + $0x10] sm:$0xf]  ;;  %v46_v8 = vmul.f32 %v40_v6, %v40_v6  ;;  %v78_v12 = vmul.f32 %v43_v11, %v43_v11 }
  0x1e   :  { %80 = vadd.xlane.f32.xlu1 %v77_v3  ;;  %48 = vadd.xlane.f32.xlu0 %v45_v4  ;;  %v79_v10 = vmul.f32 %v44_v7, %v44_v7 }
  0x1f   :  { %v53_v9 = vsel %vm52_vm0, %v47_v5, 0.0 }
  0x20   :  { %v84_v13 = vsel %vm52_vm0, %v79_v10, 0.0 }
  0x22   :  { %54 = vadd.xlane.f32.xlu1 %v53_v9  ;;  %50 = vadd.xlane.f32.xlu0 %v46_v8 }
  0x26   :  { %85 = vadd.xlane.f32.xlu1 %v84_v13  ;;  %82 = vadd.xlane.f32.xlu0 %v78_v12 }
  0xa7   :  { %v81_v14 = vpop.xlane.xlu1 %80  ;;  %v49_v15 = vpop.xlane.xlu0 %48 }
  0xa8   :  { %129 = vrsqrt.f32 %v81_v14  ;;  %vm89_vm1 = vcmp.eq.f32.partialorder %v81_v14, inf  ;;  %v92_v23 = vand.u32 2147483648, %v81_v14  ;;  %vm91_vm2 = vcmp.eq.f32.partialorder %v81_v14, 0.0 }
  0xa9   :  { %131 = vrsqrt.f32 %v49_v15  ;;  %vm58_vm3 = vcmp.eq.f32.partialorder %v49_v15, inf  ;;  %v61_v26 = vand.u32 2147483648, %v49_v15  ;;  %vm60_vm4 = vcmp.eq.f32.partialorder %v49_v15, 0.0 }
  0xab   :  { %v55_v16 = vpop.xlane.xlu1 %54  ;;  %v51_v17 = vpop.xlane.xlu0 %50 }
  0xac   :  { %133 = vrsqrt.f32 %v55_v16  ;;  %vm72_vm5 = vcmp.eq.f32.partialorder %v55_v16, inf  ;;  %vm74_vm7 = vcmp.eq.f32.partialorder %v55_v16, 0.0  ;;  %v75_v37 = vand.u32 2147483648, %v55_v16 }
  0xad   :  { %135 = vrsqrt.f32 %v51_v17  ;;  %vm65_vm8 = vcmp.eq.f32.partialorder %v51_v17, inf  ;;  %vm67_vm9 = vcmp.eq.f32.partialorder %v51_v17, 0.0  ;;  %v68_v40 = vand.u32 2147483648, %v51_v17 }
  0xaf   :  { %v86_v18 = vpop.xlane.xlu1 %85  ;;  %v83_v19 = vpop.xlane.xlu0 %82 }
  0xb0   :  { %137 = vrsqrt.f32 %v86_v18  ;;  %vm103_vm10 = vcmp.eq.f32.partialorder %v86_v18, inf  ;;  %v106_v43 = vand.u32 2147483648, %v86_v18  ;;  %vm105_vm11 = vcmp.eq.f32.partialorder %v86_v18, 0.0 }
  0xb1   :  { %139 = vrsqrt.f32 %v83_v19  ;;  %vm96_vm12 = vcmp.eq.f32.partialorder %v83_v19, inf  ;;  %v99_v46 = vand.u32 2147483648, %v83_v19  ;;  %vm98_vm13 = vcmp.eq.f32.partialorder %v83_v19, 0.0 }
  0xb5   :  { %v130_v20 = vpop.eup %129 }
  0xb6   :  { %v132_v21 = vpop.eup %131  ;;  %v88_v22 = vmul.f32 %v130_v20, %v81_v14 }
  0xb7   :  { %v57_v24 = vmul.f32 %v132_v21, %v49_v15 }
  0xb8   :  { %v90_v25 = vsel %vm89_vm1, %v81_v14, %v88_v22 }
  0xb9   :  { %v134_v27 = vpop.eup %133  ;;  %v93_v28 = vsel %vm91_vm2, %v92_v23, %v90_v25  ;;  %v59_v29 = vsel %vm58_vm3, %v49_v15, %v57_v24 }
  0xba   :  { %v136_v30 = vpop.eup %135  ;;  %v62_v31 = vsel %vm60_vm4, %v61_v26, %v59_v29  ;;  %v71_v32 = vmul.f32 %v134_v27, %v55_v16 }
  0xbb   :  { %v108_v33 = vsub.f32 %v62_v31, %v93_v28  ;;  %v64_v34 = vmul.f32 %v136_v30, %v51_v17 }
  0xbc   :  { %v73_v39 = vsel %vm72_vm5, %v55_v16, %v71_v32 }
  0xbd   :  { %v138_v35 = vpop.eup %137  ;;  %v111_v36 = vmul.f32 %v108_v33, %v108_v33  ;;  %v66_v42 = vsel %vm65_vm8, %v51_v17, %v64_v34  ;;  %v76_v47 = vsel %vm74_vm7, %v75_v37, %v73_v39 }
  0xbe   :  { %v140_v38 = vpop.eup %139  ;;  %v102_v41 = vmul.f32 %v138_v35, %v86_v18  ;;  %v69_v51 = vsel %vm67_vm9, %v68_v40, %v66_v42 }
  0xbf   :  { %115 = vst.msk [vmem:[%s225_s2] sm:$0xff] %vm114_vm6, %v111_v36  ;;  %v95_v44 = vmul.f32 %v140_v38, %v83_v19 }
  0xc0   :  { %v104_v45 = vsel %vm103_vm10, %v86_v18, %v102_v41 }
  0xc1   :  { %v107_v48 = vsel %vm105_vm11, %v106_v43, %v104_v45  ;;  %v97_v49 = vsel %vm96_vm12, %v83_v19, %v95_v44 }
  0xc2   :  { %v110_v50 = vsub.f32 %v76_v47, %v107_v48  ;;  %v100_v52 = vsel %vm98_vm13, %v99_v46, %v97_v49 }
  0xc3   :  { %v109_v53 = vsub.f32 %v69_v51, %v100_v52 }
  0xc4   :  { %v113_v54 = vmul.f32 %v110_v50, %v110_v50 }
  0xc5   :  { %v112_v55 = vmul.f32 %v109_v53, %v109_v53 }
  0xc6   :  { %118 = vst.msk [vmem:[%s225_s2 + $0x10] sm:$0xf] %vm117_vm14, %v113_v54 }
  0xc7   :  { %116 = vst.msk [vmem:[%s225_s2 + $0x8] sm:$0xff] %vm114_vm6, %v112_v55 }
  0xc8   :  { %123 = vsyncpa [#allocation3], 1 }
  0xc9   :  { %124 = vsyncpa [#allocation5], 1 }

</bundles_post_ra>
